<compile_context>
chip_gen: v7x
topology: tpu7x:2x2x1
jax: 0.10.0
libtpu: 0.0.40
codegen_flags: <defaults>
</compile_context>

<pallas_src>
import functools

import jax
import jax.numpy as jnp
from jax.experimental import pallas as pl
from jax.experimental.pallas import tpu as pltpu


def _round_up(x: int, m: int) -> int:
    return ((x + m - 1) // m) * m


def _ratio_kernel(vcol_ref, vinv_ref, o_ref):
    """One (1, TM, S) output tile: out[i, j] = v[i] * (1 / v[j]).

    vcol_ref: (1, TM, 1) column of v     (rows of this tile)
    vinv_ref: (1, 1,  S) precomputed 1/v (all columns, lane-dense)
    Pure VPU broadcast multiply + lane-dense store -> kernel stays HBM-store-bound.
    """
    o_ref[0] = vcol_ref[0] * vinv_ref[0]


def linear_ratio(x, weight, bias, *, target_tile_bytes: int = 8 * 1024 * 1024):
    """x: (B, S, IN) f32, weight: (1, IN) f32, bias: (1,) f32 -> (B, S, S) f32."""
    B, S, IN = x.shape
    x = x.astype(jnp.float32)
    w = jnp.asarray(weight, jnp.float32).reshape(1, IN)
    b = jnp.asarray(bias, jnp.float32).reshape(1)

    # ---- Stage 1 (tiny, O(B*S*IN)): plain XLA, fused by the compiler. ----
    v = x @ jnp.transpose(w) + b                      # (B, S, 1)  == torch linear
    v_inv_row = jnp.transpose(1.0 / v, (0, 2, 1))     # (B, 1, S)  == 1 / v4

    # ---- Stage 2 (dominant, O(B*S^2)): store-bound ratio, direct (B, S, S). ----
    # Full-row tiles: last block dim = S (full array dim -> always layout-legal).
    # Rows per tile sized so one tile is ~target_tile_bytes of (lane-padded) f32.
    lane_width = _round_up(S, 128)                    # VMEM lane padding of last dim
    rows_fit = max(1, target_tile_bytes // (lane_width * 4))
    if rows_fit >= S:
        TM = S                                        # whole batch-row fits one tile
    else:
        TM = max(8, (rows_fit // 8) * 8)              # multiple of 8; edge tile masked
    num_row_tiles = pl.cdiv(S, TM)

    # Lead with the larger parallel axis so v7x megacore sharding is balanced.
    if num_row_tiles >= B:
        grid = (num_row_tiles, B)
        in_specs = [
            pl.BlockSpec((1, TM, 1), lambda i, bb: (bb, i, 0)),
            pl.BlockSpec((1, 1, S), lambda i, bb: (bb, 0, 0)),
        ]
        out_spec = pl.BlockSpec((1, TM, S), lambda i, bb: (bb, i, 0))
    else:
        grid = (B, num_row_tiles)
        in_specs = [
            pl.BlockSpec((1, TM, 1), lambda bb, i: (bb, i, 0)),
            pl.BlockSpec((1, 1, S), lambda bb, i: (bb, 0, 0)),
        ]
        out_spec = pl.BlockSpec((1, TM, S), lambda bb, i: (bb, i, 0))

    out = pl.pallas_call(
        _ratio_kernel,
        out_shape=jax.ShapeDtypeStruct((B, S, S), jnp.float32),
        grid_spec=pltpu.PrefetchScalarGridSpec(
            num_scalar_prefetch=0,
            grid=grid,
            in_specs=in_specs,
            out_specs=out_spec,
        ),
        compiler_params=pltpu.CompilerParams(
            dimension_semantics=("parallel", "parallel"),
            vmem_limit_bytes=32 * 1024 * 1024,
        ),
    )(v, v_inv_row)
    return out


if __name__ == "__main__":
    key = jax.random.PRNGKey(0)
    kx, kw, kb, kt = jax.random.split(key, 4)

    # Small shapes consistent with the module (x1: (B, S, 2), Linear(2, 1)).
    # S = 160 exercises a non-128-aligned lane width (full-dim TN = S blocks).
    B, S, IN = 2, 160, 2
    x = jax.random.normal(kx, (B, S, IN), dtype=jnp.float32)
    weight = jax.random.normal(kw, (1, IN), dtype=jnp.float32) * 0.5
    bias = jax.random.normal(kb, (1,), dtype=jnp.float32) * 0.1

    def ref_fn(xx, ww, bb):
        v3 = xx @ jnp.transpose(ww) + bb              # (B, S, 1)
        v4 = jnp.transpose(v3, (0, 2, 1))             # (B, 1, S)
        return v3 / v4                                # (B, S, S)

    ref = ref_fn(x, weight, bias)

    # 1) Default config: one full-row tile per batch, grid led by B.
    out1 = jax.block_until_ready(jax.jit(linear_ratio)(x, weight, bias))
    assert out1.shape == (B, S, S)
    assert jnp.allclose(out1, ref, rtol=1e-5, atol=1e-6), \
        float(jnp.max(jnp.abs(out1 - ref)))

    # 2) Small-tile config: multiple row tiles per batch + masked edge tile
    #    (TM = 64, cdiv(160, 64) = 3), grid led by the row-tile axis.
    out2 = jax.block_until_ready(
        jax.jit(functools.partial(linear_ratio, target_tile_bytes=64 * 1024))(
            x, weight, bias))
    assert jnp.allclose(out2, ref, rtol=1e-5, atol=1e-6), \
        float(jnp.max(jnp.abs(out2 - ref)))

    # 3) The module's literal shape: x1 = (1, 2, 2) (full-dim tiny blocks).
    x_tiny = jax.random.normal(kt, (1, 2, IN), dtype=jnp.float32)
    out3 = jax.block_until_ready(jax.jit(linear_ratio)(x_tiny, weight, bias))
    ref3 = ref_fn(x_tiny, weight, bias)
    assert out3.shape == (1, 2, 2)
    assert jnp.allclose(out3, ref3, rtol=1e-5, atol=1e-6), \
        float(jnp.max(jnp.abs(out3 - ref3)))

    print("KERNEL_OK")
</pallas_src>

<mosaic_0001>
module attributes {stable_mosaic.version = 11 : i64} {
  func.func @_ratio_kernel(%arg0: i32, %arg1: i32, %arg2: memref<1x160x1xf32, #tpu.memory_space<vmem>>, %arg3: memref<1x1x160xf32, #tpu.memory_space<vmem>>, %arg4: memref<1x160x160xf32, #tpu.memory_space<vmem>>) attributes {dimension_semantics = [#tpu.dimension_semantics<parallel>, #tpu.dimension_semantics<parallel>], iteration_bounds = array<i64: 2, 1>, scalar_prefetch = 0 : i64, scratch_operands = 0 : i64, tpu.core_type = #tpu.core_type<tc>, window_params = [{transform_indices = @transform_0, window_bounds = array<i64: 1, 160, 1>}, {transform_indices = @transform_1, window_bounds = array<i64: 1, 1, 160>}, {transform_indices = @transform_2, window_bounds = array<i64: 1, 160, 160>}]} {
    %c0 = arith.constant 0 : index
    %c0_0 = arith.constant 0 : index
    %c0_1 = arith.constant 0 : index
    %0 = vector.load %arg2[%c0, %c0_0, %c0_1] : memref<1x160x1xf32, #tpu.memory_space<vmem>>, vector<1x160x1xf32>
    %1 = vector.shape_cast %0 : vector<1x160x1xf32> to vector<160x1xf32>
    %c0_2 = arith.constant 0 : index
    %c0_3 = arith.constant 0 : index
    %c0_4 = arith.constant 0 : index
    %2 = vector.load %arg3[%c0_2, %c0_3, %c0_4] : memref<1x1x160xf32, #tpu.memory_space<vmem>>, vector<1x1x160xf32>
    %3 = vector.shape_cast %2 : vector<1x1x160xf32> to vector<1x160xf32>
    %4 = vector.broadcast %1 : vector<160x1xf32> to vector<160x160xf32>
    %5 = vector.broadcast %3 : vector<1x160xf32> to vector<160x160xf32>
    %6 = arith.mulf %4, %5 : vector<160x160xf32>
    %c0_5 = arith.constant 0 : index
    %c0_6 = arith.constant 0 : index
    %c0_7 = arith.constant 0 : index
    %7 = vector.load %arg4[%c0_5, %c0_6, %c0_7] : memref<1x160x160xf32, #tpu.memory_space<vmem>>, vector<1x160x160xf32>
    %8 = vector.shape_cast %7 : vector<1x160x160xf32> to vector<160x160xf32>
    %9 = vector.shape_cast %6 : vector<160x160xf32> to vector<1x160x160xf32>
    tpu.vector_store %arg4[%c0_5, %c0_6, %c0_7], %9 {strides = array<i32>} : memref<1x160x160xf32, #tpu.memory_space<vmem>>, vector<1x160x160xf32>,
    return
  }
  func.func @transform_0(%arg0: i32, %arg1: i32) -> (i32, i32, i32) {
    %c0_i32 = arith.constant 0 : i32
    %c0_i32_0 = arith.constant 0 : i32
    return %arg0, %arg1, %c0_i32 : i32, i32, i32
  }
  func.func @transform_1(%arg0: i32, %arg1: i32) -> (i32, i32, i32) {
    %c0_i32 = arith.constant 0 : i32
    %c0_i32_0 = arith.constant 0 : i32
    %c0_i32_1 = arith.constant 0 : i32
    return %arg0, %c0_i32, %c0_i32_0 : i32, i32, i32
  }
  func.func @transform_2(%arg0: i32, %arg1: i32) -> (i32, i32, i32) {
    %c0_i32 = arith.constant 0 : i32
    %c0_i32_0 = arith.constant 0 : i32
    return %arg0, %arg1, %c0_i32 : i32, i32, i32
  }
}

</mosaic_0001>

<bundles_post_ra>
// kernel: linear_ratio.1
= control target key start
LH: loop header
LB: loop body
LE: loop exit
PB: predicated region body
PF: predicated region fallthrough
CT: control target
= control target key end

     0   :  { %7 = vsyncpa [#allocation3], 0  ;;  %s938_s0 = inlined_call_operand.vmem [shape: f32[2,160,1], index: 0, kind: input, shape index: {}]   ;;  %s939_s1 = inlined_call_operand.vmem [shape: f32[2,1,160], index: 1, kind: input, shape index: {}]   ;;  %s940_s2 = inlined_call_operand.hbm [shape: f32[2,160,160], index: 2, kind: output, shape index: {}]  }
   0x1   :  { %9 = vsyncpa [#allocation3 + $0x1], 0  ;;  %s683_s9 = smov 0   ;;  %s685_s10 = smov 0  }
   0x2   :  { %s687_s11 = smov 0   ;;  %s689_s12 = smov 0  }
   0x3   :  { %s691_s13 = smov 0   ;;  %s693_s14 = smov 0  }
   0x4 LB: > { %s511_s15 = sadd.s32 4294967295, %s662_s14   ;;  %s512_s16 = sadd.s32 4294967294, %s662_s14   ;;  %s662_s14 = sphi %s693_s14, %s15_s14   ;;  %s658_s13 = sphi %s691_s13, %s947_s13   ;;  %s654_s12 = sphi %s689_s12, %s946_s12   ;;  %s650_s11 = sphi %s687_s11, %s945_s11   ;;  %s646_s10 = sphi %s685_s10, %s944_s10   ;;  %s642_s9 = sphi %s683_s9, %s943_s9  }
   0x5   : > { %s27_s17 = sadd.s32 1, %s658_s13  ;;  %s90_s18 = sadd.s32 1, %s650_s11 }
   0x6   : > { %p29_p0 = scmp.ge.s32.totalorder %s27_s17, 2  ;;  %p100_p1 = scmp.ne.s32.totalorder %s650_s11, %s646_s10 }
   0x7   : > { %p101_p2 = scmp.eq.s32.totalorder %s511_s15, 1  ;;  %p106_p3 = scmp.ne.s32.totalorder %s646_s10, %s642_s9 }
   0x8   : > { %s949_s17 = smov (%p29_p0, %s27_s17), 0  ;;  %p107_p5 = scmp.eq.s32.totalorder %s512_s16, 1 }
   0x9   : > { %p723_p4 = por %p101_p2, %p100_p1  ;;  %s85_s20 = ssub.s32 %s658_s13, %s949_s17 }
   0xa   : > { %p515_p6 = scmp.ge.s32.totalorder %s662_s14, 1  ;;  %p88_p7 = scmp.eq.s32.totalorder %s85_s20, 0 }
   0xb   : > { %p730_p8 = por %p107_p5, %p106_p3  ;;  %p145_p9 = scmp.lt.s32.totalorder %s662_s14, 3 }
   0xc   : > { %s736_s22 = scalar_select %p88_p7, %s650_s11, %s90_s18  }
   0xd   : > { %p146_p10 = pnand %p515_p6, %p145_p9 }
   0xe   : > { %p176_p11 = scmp.lt.s32.totalorder (!%p146_p10), %s654_s12, 1  ;;  %v664_v0 = vmov (!%p146_p10), 0   ;;  %v312_v21 = vlaneseq (!%p146_p10)  ;;  %s172_s4 = sand.u32 (!%p146_p10), 1, %s646_s10   ;;  %vm363_vm0 = vcmask (!%p146_p10), 261120  }
   0xf   : > { %149 = sbr.rel (%p146_p10) target bundleno = 210 (0xd2), region = 28  ;;  %583 = vset.pattern.permute.xlu1 (!%p146_p10), %v664_v0  ;;  %582 = vset.pattern.permute.xlu0 (!%p146_p10), %v664_v0  ;;  %s892_s18 = scalar_lea.sflag (!%p146_p10), [#allocation3], %s172_s4 }
  0x10   : > { %v313_v22 = vshrl.u32 (!%p146_p10), %v312_v21, 7  ;;  %s521_s5 = smul.u32 (!%p146_p10), 320, %s172_s4 }
  0x11   : > { %s523_s7 = smul.u32 (!%p146_p10), 5120, %s654_s12 }
  0x12   : > { %v314_v23 = vsub.s32 (!%p146_p10), 0, %v313_v22  ;;  %v318_v24 = vsub.s32 (!%p146_p10), 1, %v313_v22  ;;  %s783_s6 = scalar_lea.vmem (!%p146_p10), [#allocation2], %s521_s5 }
  0x13   : > { %s420_s8 = sshll.u32 (!%p146_p10), %s783_s6, 4  ;;  %s876_s16 = scalar_lea.hbm (!%p146_p10), %s940_s2, %s523_s7  ;;  %s878_s8 = int_to_ptr.vmem [resolvable:$true] %s420_s8 }
  0x14   : > { %s584_s20 = scalar_lea.vmem (!%p146_p10), %s878_s8, 5120 }
  0x15   : > { %p585_p12 = scmp.ne.s32.totalorder (!%p146_p10), %s878_s8, %s584_s20 }
  0x16   : > { %s740_s23 = scalar_select %p176_p11, %s654_s12, 1 }
  0x17   : > { %p586_p13 = pnand %p585_p12, %p723_p4 }
  0x18   : > { %s522_s24 = smul.u32 160, %s740_s23  ;;  %s517_s28 = sshll.u32 %s740_s23, 1 }
  0x19   : > { %s188_s3 = scalar_lea.vmem %s939_s1, %s517_s28  ;;  %p587_p0 = pneg %p586_p13 }
  0x1a   : > { %s746_s27 = scalar_lea.vmem %s938_s0, %s522_s24  ;;  %v210_v25 = vld [vmem:[%s188_s3] sm:$0x3]  ;;  %s665_s23 = smov [#allocation2]  }
  0x1b   : > { %v192_v1 = vld [vmem:[%s746_s27 + $0x10] sm:$0xff]  ;;  %v190_v2 = vld [vmem:[%s746_s27] sm:$0xff]  ;;  %v193_v3 = vld [vmem:[%s746_s27 + $0x18] sm:$0xff]  ;;  %v775_v26 = vrot.slane %v210_v25, %v314_v23  ;;  %v777_v27 = vrot.slane %v210_v25, %v318_v24  ;;  %s588_s24 = sshll.u32 %s665_s23, 4  ;;  %s589_s24 = int_to_ptr.vmem [resolvable:$false] %s588_s24 }
  0x1c   : > { %223 = vperm.xlu1 %583, %v192_v1   ;;  %213 = vperm.xlu0 %582, %v190_v2   ;;  %v191_v4 = vld [vmem:[%s746_s27 + $0x8] sm:$0xff]  ;;  %v194_v6 = vld [vmem:[%s746_s27 + $0x20] sm:$0xff]  ;;  %v197_v7 = vld [vmem:[%s746_s27 + $0x38] sm:$0xff]  ;;  %s590_s25 = scalar_lea.vmem %s589_s24, 10240  ;;  %p591_p1 = scmp.lt.s32.totalorder %s878_s8, %s589_s24 }
  0x1d   : > { %v195_v5 = vld [vmem:[%s746_s27 + $0x28] sm:$0xff]  ;;  %v196_v8 = vld [vmem:[%s746_s27 + $0x30] sm:$0xff]  ;;  %v198_v10 = vld [vmem:[%s746_s27 + $0x40] sm:$0xff]  ;;  %p592_p2 = scmp.lt.s32.totalorder %s590_s25, %s584_s20 }
  0x1e   : > { %v199_v9 = vld [vmem:[%s746_s27 + $0x48] sm:$0xff]  ;;  %v201_v11 = vld [vmem:[%s746_s27 + $0x58] sm:$0xff]  ;;  %v200_v12 = vld [vmem:[%s746_s27 + $0x50] sm:$0xff] }
  0x1f   : > { %v203_v13 = vld [vmem:[%s746_s27 + $0x68] sm:$0xff]  ;;  %v202_v14 = vld [vmem:[%s746_s27 + $0x60] sm:$0xff]  ;;  %v205_v15 = vld [vmem:[%s746_s27 + $0x78] sm:$0xff]  ;;  %p593_p3 = por %p592_p2, %p591_p1 }
  0x20   : > { %228 = vperm.xlu1 %583, %v193_v3   ;;  %218 = vperm.xlu0 %582, %v191_v4   ;;  %v204_v16 = vld [vmem:[%s746_s27 + $0x70] sm:$0xff]  ;;  %v207_v17 = vld [vmem:[%s746_s27 + $0x88] sm:$0xff]  ;;  %v206_v18 = vld [vmem:[%s746_s27 + $0x80] sm:$0xff] }
  0x21   : > { %v209_v19 = vld [vmem:[%s746_s27 + $0x98] sm:$0xff]  ;;  %v208_v20 = vld [vmem:[%s746_s27 + $0x90] sm:$0xff]  ;;  %p594_p5 = pnand %p593_p3, %p587_p0 }
  0x24   : > { %238 = vperm.xlu1 %583, %v195_v5   ;;  %233 = vperm.xlu0 %582, %v194_v6  }
  0x28   : > { %248 = vperm.xlu1 %583, %v197_v7   ;;  %243 = vperm.xlu0 %582, %v196_v8  }
  0x2c   : > { %258 = vperm.xlu1 %583, %v199_v9   ;;  %253 = vperm.xlu0 %582, %v198_v10  }
  0x30   : > { %268 = vperm.xlu1 %583, %v201_v11   ;;  %263 = vperm.xlu0 %582, %v200_v12  }
  0x34   : > { %278 = vperm.xlu1 %583, %v203_v13   ;;  %273 = vperm.xlu0 %582, %v202_v14  }
  0x38   : > { %288 = vperm.xlu1 %583, %v205_v15   ;;  %283 = vperm.xlu0 %582, %v204_v16  }
  0x3c   : > { %298 = vperm.xlu1 %583, %v207_v17   ;;  %293 = vperm.xlu0 %582, %v206_v18  }
  0x40   : > { %308 = vperm.xlu1 %583, %v209_v19   ;;  %303 = vperm.xlu0 %582, %v208_v20  }
  0x9b   : > { %v224_v28 = vpop.permute.xlu1 %223  ;;  %v214_v29 = vpop.permute.xlu0 %213 }
  0x9c   : > { %v326_v30 = vmul.f32 %v775_v26, %v224_v28  ;;  %v327_v31 = vmul.f32 %v777_v27, %v224_v28  ;;  %v322_v32 = vmul.f32 %v775_v26, %v214_v29  ;;  %v323_v33 = vmul.f32 %v777_v27, %v214_v29 }
  0x9e   : > { %367 = vst [vmem:[%s783_s6 + $0x20] sm:$0xff] %v326_v30  ;;  %368 = vst.msk [vmem:[%s783_s6 + $0x28] sm:$0xff] %vm363_vm0, %v327_v31 }
  0x9f   : > { %362 = vst [vmem:[%s783_s6] sm:$0xff] %v322_v32  ;;  %364 = vst.msk [vmem:[%s783_s6 + $0x8] sm:$0xff] %vm363_vm0, %v323_v33  ;;  %v229_v34 = vpop.permute.xlu1 %228  ;;  %v219_v35 = vpop.permute.xlu0 %218 }
  0xa0   : > { %v328_v36 = vmul.f32 %v775_v26, %v229_v34  ;;  %v329_v37 = vmul.f32 %v777_v27, %v229_v34  ;;  %v324_v38 = vmul.f32 %v775_v26, %v219_v35  ;;  %v325_v39 = vmul.f32 %v777_v27, %v219_v35 }
  0xa2   : > { %369 = vst [vmem:[%s783_s6 + $0x30] sm:$0xff] %v328_v36  ;;  %370 = vst.msk [vmem:[%s783_s6 + $0x38] sm:$0xff] %vm363_vm0, %v329_v37 }
  0xa3   : > { %365 = vst [vmem:[%s783_s6 + $0x10] sm:$0xff] %v324_v38  ;;  %366 = vst.msk [vmem:[%s783_s6 + $0x18] sm:$0xff] %vm363_vm0, %v325_v39  ;;  %v239_v40 = vpop.permute.xlu1 %238  ;;  %v234_v41 = vpop.permute.xlu0 %233 }
  0xa4   : > { %v332_v42 = vmul.f32 %v775_v26, %v239_v40  ;;  %v333_v43 = vmul.f32 %v777_v27, %v239_v40  ;;  %v330_v44 = vmul.f32 %v775_v26, %v234_v41  ;;  %v331_v45 = vmul.f32 %v777_v27, %v234_v41 }
  0xa6   : > { %373 = vst [vmem:[%s783_s6 + $0x50] sm:$0xff] %v332_v42  ;;  %374 = vst.msk [vmem:[%s783_s6 + $0x58] sm:$0xff] %vm363_vm0, %v333_v43 }
  0xa7   : > { %371 = vst [vmem:[%s783_s6 + $0x40] sm:$0xff] %v330_v44  ;;  %372 = vst.msk [vmem:[%s783_s6 + $0x48] sm:$0xff] %vm363_vm0, %v331_v45  ;;  %v249_v46 = vpop.permute.xlu1 %248  ;;  %v244_v47 = vpop.permute.xlu0 %243 }
  0xa8   : > { %v336_v48 = vmul.f32 %v775_v26, %v249_v46  ;;  %v337_v49 = vmul.f32 %v777_v27, %v249_v46  ;;  %v334_v50 = vmul.f32 %v775_v26, %v244_v47  ;;  %v335_v51 = vmul.f32 %v777_v27, %v244_v47 }
  0xaa   : > { %377 = vst [vmem:[%s783_s6 + $0x70] sm:$0xff] %v336_v48  ;;  %378 = vst.msk [vmem:[%s783_s6 + $0x78] sm:$0xff] %vm363_vm0, %v337_v49 }
  0xab   : > { %375 = vst [vmem:[%s783_s6 + $0x60] sm:$0xff] %v334_v50  ;;  %376 = vst.msk [vmem:[%s783_s6 + $0x68] sm:$0xff] %vm363_vm0, %v335_v51  ;;  %v259_v52 = vpop.permute.xlu1 %258  ;;  %v254_v53 = vpop.permute.xlu0 %253 }
  0xac   : > { %v340_v54 = vmul.f32 %v775_v26, %v259_v52  ;;  %v341_v55 = vmul.f32 %v777_v27, %v259_v52  ;;  %v338_v56 = vmul.f32 %v775_v26, %v254_v53  ;;  %v339_v57 = vmul.f32 %v777_v27, %v254_v53 }
  0xae   : > { %381 = vst [vmem:[%s783_s6 + $0x90] sm:$0xff] %v340_v54  ;;  %382 = vst.msk [vmem:[%s783_s6 + $0x98] sm:$0xff] %vm363_vm0, %v341_v55 }
  0xaf   : > { %379 = vst [vmem:[%s783_s6 + $0x80] sm:$0xff] %v338_v56  ;;  %380 = vst.msk [vmem:[%s783_s6 + $0x88] sm:$0xff] %vm363_vm0, %v339_v57  ;;  %v269_v58 = vpop.permute.xlu1 %268  ;;  %v264_v59 = vpop.permute.xlu0 %263 }
  0xb0   : > { %v344_v60 = vmul.f32 %v775_v26, %v269_v58  ;;  %v345_v61 = vmul.f32 %v777_v27, %v269_v58  ;;  %v342_v62 = vmul.f32 %v775_v26, %v264_v59  ;;  %v343_v63 = vmul.f32 %v777_v27, %v264_v59 }
  0xb2   : > { %385 = vst [vmem:[%s783_s6 + $0xb0] sm:$0xff] %v344_v60  ;;  %386 = vst.msk [vmem:[%s783_s6 + $0xb8] sm:$0xff] %vm363_vm0, %v345_v61 }
  0xb3   : > { %383 = vst [vmem:[%s783_s6 + $0xa0] sm:$0xff] %v342_v62  ;;  %384 = vst.msk [vmem:[%s783_s6 + $0xa8] sm:$0xff] %vm363_vm0, %v343_v63  ;;  %v279_v0 = vpop.permute.xlu1 %278  ;;  %v274_v1 = vpop.permute.xlu0 %273 }
  0xb4   : > { %v348_v2 = vmul.f32 %v775_v26, %v279_v0  ;;  %v349_v3 = vmul.f32 %v777_v27, %v279_v0  ;;  %v346_v4 = vmul.f32 %v775_v26, %v274_v1  ;;  %v347_v5 = vmul.f32 %v777_v27, %v274_v1 }
  0xb6   : > { %389 = vst [vmem:[%s783_s6 + $0xd0] sm:$0xff] %v348_v2  ;;  %390 = vst.msk [vmem:[%s783_s6 + $0xd8] sm:$0xff] %vm363_vm0, %v349_v3 }
  0xb7   : > { %387 = vst [vmem:[%s783_s6 + $0xc0] sm:$0xff] %v346_v4  ;;  %388 = vst.msk [vmem:[%s783_s6 + $0xc8] sm:$0xff] %vm363_vm0, %v347_v5  ;;  %v289_v6 = vpop.permute.xlu1 %288  ;;  %v284_v7 = vpop.permute.xlu0 %283 }
  0xb8   : > { %v352_v8 = vmul.f32 %v775_v26, %v289_v6  ;;  %v353_v9 = vmul.f32 %v777_v27, %v289_v6  ;;  %v350_v10 = vmul.f32 %v775_v26, %v284_v7  ;;  %v351_v11 = vmul.f32 %v777_v27, %v284_v7 }
  0xba   : > { %393 = vst [vmem:[%s783_s6 + $0xf0] sm:$0xff] %v352_v8  ;;  %394 = vst.msk [vmem:[%s783_s6 + $0xf8] sm:$0xff] %vm363_vm0, %v353_v9 }
  0xbb   : > { %391 = vst [vmem:[%s783_s6 + $0xe0] sm:$0xff] %v350_v10  ;;  %392 = vst.msk [vmem:[%s783_s6 + $0xe8] sm:$0xff] %vm363_vm0, %v351_v11  ;;  %v299_v12 = vpop.permute.xlu1 %298  ;;  %v294_v13 = vpop.permute.xlu0 %293 }
  0xbc   : > { %v356_v14 = vmul.f32 %v775_v26, %v299_v12  ;;  %v357_v15 = vmul.f32 %v777_v27, %v299_v12  ;;  %v354_v16 = vmul.f32 %v775_v26, %v294_v13  ;;  %v355_v17 = vmul.f32 %v777_v27, %v294_v13 }
  0xbe   : > { %397 = vst [vmem:[%s783_s6 + $0x110] sm:$0xff] %v356_v14  ;;  %398 = vst.msk [vmem:[%s783_s6 + $0x118] sm:$0xff] %vm363_vm0, %v357_v15 }
  0xbf   : > { %395 = vst [vmem:[%s783_s6 + $0x100] sm:$0xff] %v354_v16  ;;  %396 = vst.msk [vmem:[%s783_s6 + $0x108] sm:$0xff] %vm363_vm0, %v355_v17  ;;  %v309_v18 = vpop.permute.xlu1 %308  ;;  %v304_v19 = vpop.permute.xlu0 %303 }
  0xc0   : > { %v360_v20 = vmul.f32 %v775_v26, %v309_v18  ;;  %v361_v21 = vmul.f32 %v777_v27, %v309_v18  ;;  %v358_v22 = vmul.f32 %v775_v26, %v304_v19  ;;  %v359_v23 = vmul.f32 %v777_v27, %v304_v19 }
  0xc2   : > { %401 = vst [vmem:[%s783_s6 + $0x130] sm:$0xff] %v360_v20  ;;  %402 = vst.msk [vmem:[%s783_s6 + $0x138] sm:$0xff] %vm363_vm0, %v361_v21 }
  0xc3   : > { %399 = vst [vmem:[%s783_s6 + $0x120] sm:$0xff] %v358_v22  ;;  %400 = vst.msk [vmem:[%s783_s6 + $0x128] sm:$0xff] %vm363_vm0, %v359_v23 }
  0xc4   : > { %597 = shalt.err (!%p594_p5)
}
  0xc5   : > { %s598_s26 = scalar_lea.hbm %s876_s16, 5120  ;;  %s602_s29 = scalar_lea.hbm %s940_s2, 10240 }
  0xc6   : > { %p599_p6 = scmp.ne.s32.totalorder %s876_s16, %s598_s26  ;;  %p603_p10 = scmp.lt.u32.totalorder %s876_s16, %s940_s2 }
  0xc7   : > { %p604_p11 = scmp.lt.u32.totalorder %s602_s29, %s598_s26  ;;  %p606_p13 = scmp.lt.u32.totalorder %s598_s26, %s876_s16 }
  0xc8   : > { %p600_p7 = pnand %p599_p6, %p723_p4 }
  0xc9   : > { %p605_p12 = por %p604_p11, %p603_p10 }
  0xca   : > { %p601_p9 = pneg %p600_p7 }
  0xcb   : > { %p607_p0 = por %p606_p13, %p605_p12 }
  0xcd   : > { %p608_p1 = pnand %p607_p0, %p601_p9 }
  0xcf   : > { %611 = shalt.err (!%p608_p1)
}
  0xd0   : > { %s666_s4 = smov 256   ;;  %s667_s5 = smov 16  }
  0xd1   : > { %524 = dma.vmem_to_hbm [thread:$0]  (%p723_p4), %s878_s8, 5120, %s876_s16, %s892_s18, %s666_s4, %s666_s4, %s667_s5  }
  0xd2 PF: > { %p530_p2 = scmp.ge.s32.totalorder %s662_s14, 2  ;;  %s435_s6 = sand.u32 1, %s642_s9  }
  0xd3   : > { %s436_s7 = scalar_lea.sflag [#allocation3], %s435_s6 }
  0xd4   : > { %p527_p3 = pnand %p530_p2, %p730_p8 }
  0xd6   : > { %637 = dma.done.wait (!%p527_p3), %s436_s7, 5120  }
  0xd7   : > { %639 = vsyncadd (!%p527_p3), %s436_s7, 4294962176  ;;  %s15_s14 = sadd.s32 1, %s662_s14   ;;  %s943_s9 = smov %s646_s10 }
  0xd8   : > { %p12_p5 = scmp.ge.s32.totalorder %s15_s14, 4   ;;  %s944_s10 = smov %s650_s11 }
  0xd9   : > { %s945_s11 = smov %s736_s22  ;;  %s946_s12 = smov %s658_s13 }
  0xda   : > { %s947_s13 = smov %s949_s17  ;;  %14 = sbr.rel (!%p12_p5) target bundleno = 4 (0x4), region = 66 }
  0xe1   :  { %441 = vsyncpa [#allocation3], 1 }
  0xe2   :  { %443 = vsyncpa [#allocation3 + $0x1], 1 }

</bundles_post_ra>
